<compile_context>
chip_gen: v6e
topology: v6e:2x2x1
jax: 0.10.0
libtpu: 0.0.40
codegen_flags: <defaults>
</compile_context>

<pallas_src>
import functools
import math

import jax
import jax.numpy as jnp
from jax import lax
from jax.experimental import pallas as pl
from jax.experimental.pallas import tpu as pltpu


# ---------------------------------------------------------------------------
# Kernels
# ---------------------------------------------------------------------------

def _rotate_take_kernel(src_ref, x_ref, o_ref):
    """Primary path: lane gather against a VMEM-resident input slab.

    src_ref : (1, TO)    int32 flat source index per output pixel (-1 => 0 fill)
    x_ref   : (TBC, HWp) resident input rows (pixels on lanes)
    o_ref   : (TBC, TO)  lane-dense output strip
    """
    src = src_ref[...]                                       # (1, TO) int32
    hwp = x_ref.shape[-1]
    idx = jnp.clip(src, 0, hwp - 1)                          # (1, TO)
    x = x_ref[...]                                           # (TBC, HWp)
    idx_b = jnp.broadcast_to(idx, (x.shape[0], idx.shape[-1]))
    g = jnp.take_along_axis(x, idx_b, axis=-1)               # (TBC, TO)
    o_ref[...] = jnp.where(src >= 0, g, jnp.zeros_like(g)).astype(o_ref.dtype)


def _rotate_onehot_kernel(src_ref, x_ref, o_ref, *, ti):
    """Fallback path: tiled gather-as-one-hot-matmul (guaranteed lowering).

    src_ref : (1, TO)  int32 flat source index per output pixel (-1 => 0 fill)
    x_ref   : (BC, TI) input pixels for this contraction tile
    o_ref   : (BC, TO) output strip, resident across the contraction axis
    """
    it = pl.program_id(1)
    base = it * ti
    # Hoist `base` onto the (1, TO) src vector instead of adding it to the
    # full (TI, TO) iota (saves a full-tile VALU add per contraction step).
    src_rel = src_ref[...] - base                            # (1, TO)
    to = src_rel.shape[-1]
    i_iota = lax.broadcasted_iota(jnp.int32, (ti, to), 0)
    # Note(v5e): no bf16 VALU there, so bf16 sel isn't cheaper; bf16 is only
    # picked when the data itself is bf16 (keeps the MXU path narrow).
    compute_dtype = (jnp.bfloat16 if x_ref.dtype == jnp.bfloat16
                     else jnp.float32)
    sel = (i_iota == src_rel).astype(compute_dtype)          # (TI, TO)
    x = x_ref[...].astype(compute_dtype)                     # (BC, TI)
    contrib = jnp.dot(x, sel,
                      preferred_element_type=jnp.float32).astype(o_ref.dtype)

    @pl.when(it == 0)
    def _():
        o_ref[...] = contrib

    @pl.when(it != 0)
    def _():
        # Exactly one nonzero contribution per output column over all tiles,
        # so accumulating in the output dtype is exact (no f32 scratch).
        o_ref[...] += contrib


# ---------------------------------------------------------------------------
# Tiling helpers
# ---------------------------------------------------------------------------

def _pick_strip(hwp):
    """Largest lane-aligned output strip <= 512 dividing hwp with >= 2 strips
    (keeps the parallel axis >= 2 for the two v7x TensorCores)."""
    for t in (512, 256, 128):
        if hwp % t == 0 and hwp // t >= 2:
            return t
    return hwp  # hwp == 128


def _pick_ktile(hwp):
    """Contraction tile for the one-hot fallback (bounds the sel slab)."""
    for t in (512, 256, 128):
        if hwp % t == 0:
            return t
    return hwp


def _pick_bc_tile(bc, hwp, itemsize, budget=36 * 1024 * 1024):
    """Rows kept resident per grid step; stays under a v7x-safe VMEM budget
    (double-buffer factor of 2 included)."""
    if 2 * bc * hwp * itemsize <= budget:
        return bc
    sub = max(8, 32 // itemsize)  # sublane multiple (8 f32 / 16 bf16)
    for d in range(bc, 0, -1):
        if bc % d == 0 and d % sub == 0 and 2 * d * hwp * itemsize <= budget:
            return d
    # TODO(synk): pad BC in the wrapper when no sublane-aligned divisor fits.
    return bc


# ---------------------------------------------------------------------------
# pallas_call builders
# ---------------------------------------------------------------------------

def _rotate_pallas_gather(src_flat, x2d):
    bc, hwp = x2d.shape
    to = _pick_strip(hwp)
    tbc = _pick_bc_tile(bc, hwp, x2d.dtype.itemsize)
    grid = (bc // tbc, hwp // to)
    return pl.pallas_call(
        _rotate_take_kernel,
        out_shape=jax.ShapeDtypeStruct((bc, hwp), x2d.dtype),
        grid_spec=pltpu.PrefetchScalarGridSpec(
            num_scalar_prefetch=0,
            grid=grid,
            in_specs=[
                pl.BlockSpec((1, to), lambda b, o: (0, o)),     # src indices
                pl.BlockSpec((tbc, hwp), lambda b, o: (b, 0)),  # resident rows
            ],
            out_specs=pl.BlockSpec((tbc, to), lambda b, o: (b, o)),
        ),
        compiler_params=pltpu.CompilerParams(
            dimension_semantics=("parallel", "parallel"),
            vmem_limit_bytes=48 * 1024 * 1024,
        ),
    )(src_flat, x2d)


def _rotate_pallas_onehot(src_flat, x2d):
    bc, hwp = x2d.shape
    to = _pick_strip(hwp)
    ti = _pick_ktile(hwp)
    grid = (hwp // to, hwp // ti)
    return pl.pallas_call(
        functools.partial(_rotate_onehot_kernel, ti=ti),
        out_shape=jax.ShapeDtypeStruct((bc, hwp), x2d.dtype),
        grid_spec=pltpu.PrefetchScalarGridSpec(
            num_scalar_prefetch=0,
            grid=grid,
            in_specs=[
                pl.BlockSpec((1, to), lambda o, k: (0, o)),    # source indices
                pl.BlockSpec((bc, ti), lambda o, k: (0, k)),   # input tile
            ],
            out_specs=pl.BlockSpec((bc, to), lambda o, k: (0, o)),
        ),
        compiler_params=pltpu.CompilerParams(
            dimension_semantics=("parallel", "arbitrary"),
            vmem_limit_bytes=32 * 1024 * 1024,
        ),
    )(src_flat, x2d)


@functools.lru_cache(maxsize=None)
def _select_impl(bc, hwp, dtype_name):
    """Probe the lane-gather lowering for this shape; fall back to the
    one-hot matmul if Mosaic rejects it (or miscompiles it)."""
    dtype = jnp.dtype(dtype_name)
    try:
        x = (jnp.arange(bc * hwp, dtype=jnp.float32) % 251.0)
        x = x.astype(dtype).reshape(bc, hwp)
        src = (hwp - 1) - jnp.arange(hwp, dtype=jnp.int32)
        src = jnp.where(jnp.arange(hwp) % 7 == 0, -1, src).reshape(1, hwp)
        got = jax.block_until_ready(jax.jit(_rotate_pallas_gather)(src, x))
        want = jnp.where(
            src >= 0,
            jnp.take(x, jnp.clip(src[0], 0, hwp - 1), axis=1),
            jnp.zeros((), dtype),
        ).astype(dtype)
        tol = 1e-2 if dtype == jnp.bfloat16 else 1e-6
        if not bool(jnp.allclose(got.astype(jnp.float32),
                                 want.astype(jnp.float32), atol=tol)):
            return "onehot"
        return "gather"
    except Exception:
        return "onehot"


def _rotate_pallas(x2d, src_flat):
    impl = _select_impl(x2d.shape[0], x2d.shape[1], x2d.dtype.name)
    if impl == "gather":
        return _rotate_pallas_gather(src_flat, x2d)
    return _rotate_pallas_onehot(src_flat, x2d)


# ---------------------------------------------------------------------------
# Index math + wrapper
# ---------------------------------------------------------------------------

def _src_indices(H, W, HWp, cos_t, sin_t):
    """Flat nearest-neighbor source index per (padded) output pixel;
    -1 => zero fill (out of source bounds, or a padded output column)."""
    o = jnp.arange(HWp, dtype=jnp.int32)
    in_range = o < H * W
    oy = (o // W).astype(jnp.float32)
    ox = (o % W).astype(jnp.float32)
    # Rotation center = ((W-1)/2, (H-1)/2), matching torchvision's affine grid
    # (pixel-center coordinates about the image center).
    cy = (H - 1) * 0.5
    cx = (W - 1) * 0.5
    dy = oy - cy
    dx = ox - cx
    # Inverse affine map (scale=1, shear=0).
    src_x = cos_t * dx + sin_t * dy + cx
    src_y = -sin_t * dx + cos_t * dy + cy
    # Half-to-even rounding (matches grid_sample nearest / nearbyint).
    sx = jnp.round(src_x).astype(jnp.int32)
    sy = jnp.round(src_y).astype(jnp.int32)
    valid = in_range & (sx >= 0) & (sx < W) & (sy >= 0) & (sy < H)
    return jnp.where(valid, sy * W + sx, -1).reshape(1, HWp)


def rotation_forward(img, key, p=0.5, degree=20):
    """JAX/Pallas equivalent of Rotation(p, degree).forward(img).

    img: NCHW array [B, C, H, W].
    key: PRNG key replacing torch.rand / random.randint.
    """
    B, C, H, W = img.shape
    k1, k2 = jax.random.split(key)
    # torch.rand(1) < p  -> rotation branch taken
    apply = jax.random.uniform(k1, ()) < p
    # random.randint(-degree, degree) is inclusive on both ends
    deg = jax.random.randint(k2, (), -degree, degree + 1).astype(jnp.float32)
    theta = deg * (math.pi / 180.0)

    HW = H * W
    HWp = ((HW + 127) // 128) * 128  # lane-dense, (8,128)-aligned tiles

    def _rotate(x):
        src_flat = _src_indices(H, W, HWp, jnp.cos(theta), jnp.sin(theta))
        x2d = x.reshape(B * C, HW)
        if HWp != HW:
            x2d = jnp.pad(x2d, ((0, 0), (0, HWp - HW)))
        out2d = _rotate_pallas(x2d, src_flat)
        return out2d[:, :HW].reshape(B, C, H, W)

    def _identity(x):
        return x

    # Skip all rotation work (index math, padding, kernel) when not applied.
    return lax.cond(apply, _rotate, _identity, img)


def _reference_rotate(img, theta):
    """Pure-JAX reference: same index math, plain gather."""
    B, C, H, W = img.shape
    HW = H * W
    src = _src_indices(H, W, HW, jnp.cos(theta), jnp.sin(theta))[0]
    x2d = img.reshape(B * C, HW)
    gathered = jnp.take(x2d, jnp.clip(src, 0, HW - 1), axis=1)
    return jnp.where(src[None, :] >= 0, gathered, 0.0).reshape(B, C, H, W)


if __name__ == "__main__":
    key = jax.random.PRNGKey(0)
    kimg, kaug = jax.random.split(key)

    B, C, H, W = 2, 4, 16, 16
    img = jax.random.uniform(kimg, (B, C, H, W), dtype=jnp.float32)

    fwd = jax.jit(rotation_forward, static_argnames=("p", "degree"))

    # Default module behaviour (p=0.5, degree=20).
    out = fwd(img, kaug, p=0.5, degree=20)
    jax.block_until_ready(out)
    assert out.shape == img.shape and out.dtype == img.dtype

    # Identity branch (p=0.0): must return the input unchanged.
    out_id = fwd(img, kaug, p=0.0, degree=20)
    assert jnp.array_equal(out_id, img)

    # Forced rotation branch (p=1.0): compare against the pure-JAX reference.
    _, k2 = jax.random.split(kaug)
    deg = jax.random.randint(k2, (), -20, 21).astype(jnp.float32)
    theta = deg * (math.pi / 180.0)

    out_rot = fwd(img, kaug, p=1.0, degree=20)
    assert jnp.allclose(out_rot, _reference_rotate(img, theta), atol=1e-6)

    # Larger image (H*W = 1024 -> multiple strips) exercises the tiled path.
    img2 = jax.random.uniform(kimg, (2, 4, 32, 32), dtype=jnp.float32)
    out2 = fwd(img2, kaug, p=1.0, degree=20)
    jax.block_until_ready(out2)
    assert jnp.allclose(out2, _reference_rotate(img2, theta), atol=1e-6)

    # Non-multiple-of-128 H*W (20x20 -> padded to 512) exercises wrapper-side
    # padding plus a non-multiple-of-8 B*C.
    img3 = jax.random.uniform(kimg, (1, 3, 20, 20), dtype=jnp.float32)
    out3 = fwd(img3, kaug, p=1.0, degree=20)
    jax.block_until_ready(out3)
    assert jnp.allclose(out3, _reference_rotate(img3, theta), atol=1e-6)

    print("KERNEL_OK")
</pallas_src>

<mosaic_0001>
module attributes {stable_mosaic.version = 11 : i64} {
  func.func @_rotate_take_kernel(%arg0: i32, %arg1: i32, %arg2: memref<1x128xi32, #tpu.memory_space<vmem>>, %arg3: memref<8x256xf32, #tpu.memory_space<vmem>>, %arg4: memref<8x128xf32, #tpu.memory_space<vmem>>) attributes {dimension_semantics = [#tpu.dimension_semantics<parallel>, #tpu.dimension_semantics<parallel>], iteration_bounds = array<i64: 1, 2>, scalar_prefetch = 0 : i64, scratch_operands = 0 : i64, tpu.core_type = #tpu.core_type<tc>, window_params = [{transform_indices = @transform_0, window_bounds = array<i64: 1, 128>}, {transform_indices = @transform_1, window_bounds = array<i64: 8, 256>}, {transform_indices = @transform_2, window_bounds = array<i64: 8, 128>}]} {
    %c0 = arith.constant 0 : index
    %c0_0 = arith.constant 0 : index
    %0 = vector.load %arg2[%c0, %c0_0] : memref<1x128xi32, #tpu.memory_space<vmem>>, vector<1x128xi32>
    %c0_i32 = arith.constant 0 : i32
    %c255_i32 = arith.constant 255 : i32
    %1 = vector.broadcast %c0_i32 : i32 to vector<1x128xi32>
    %2 = arith.maxsi %1, %0 : vector<1x128xi32>
    %3 = vector.broadcast %c255_i32 : i32 to vector<1x128xi32>
    %4 = arith.minsi %3, %2 : vector<1x128xi32>
    %c0_1 = arith.constant 0 : index
    %c0_2 = arith.constant 0 : index
    %5 = vector.load %arg3[%c0_1, %c0_2] : memref<8x256xf32, #tpu.memory_space<vmem>>, vector<8x256xf32>
    %6 = vector.shape_cast %4 : vector<1x128xi32> to vector<1x128xi32>
    %7 = vector.broadcast %6 : vector<1x128xi32> to vector<8x128xi32>
    %c0_i32_3 = arith.constant 0 : i32
    %8 = vector.broadcast %c0_i32_3 : i32 to vector<8x128xi32>
    %9 = arith.cmpi slt, %7, %8 : vector<8x128xi32>
    %c256_i32 = arith.constant 256 : i32
    %10 = vector.broadcast %c256_i32 : i32 to vector<8x128xi32>
    %11 = arith.addi %7, %10 : vector<8x128xi32>
    %12 = arith.select %9, %11, %7 : vector<8x128xi1>, vector<8x128xi32>
    %13 = vector.shape_cast %12 : vector<8x128xi32> to vector<8x128x1xi32>
    %14 = vector.shape_cast %13 : vector<8x128x1xi32> to vector<8x128xi32>
    %15 = tpu.dynamic_gather %5[%14] in [1] : vector<8x256xf32>, vector<8x128xi32> -> vector<8x128xf32>
    %c0_i32_4 = arith.constant 0 : i32
    %16 = vector.broadcast %c0_i32_4 : i32 to vector<1x128xi32>
    %17 = arith.cmpi sge, %0, %16 : vector<1x128xi32>
    %cst = arith.constant 0.000000e+00 : f32
    %18 = vector.broadcast %cst : f32 to vector<8x128xf32>
    %19 = vector.shape_cast %17 : vector<1x128xi1> to vector<1x128xi1>
    %20 = vector.broadcast %19 : vector<1x128xi1> to vector<8x128xi1>
    %21 = arith.select %20, %15, %18 : vector<8x128xi1>, vector<8x128xf32>
    %c0_5 = arith.constant 0 : index
    %c0_6 = arith.constant 0 : index
    %22 = vector.load %arg4[%c0_5, %c0_6] : memref<8x128xf32, #tpu.memory_space<vmem>>, vector<8x128xf32>
    tpu.vector_store %arg4[%c0_5, %c0_6], %21 {strides = array<i32>} : memref<8x128xf32, #tpu.memory_space<vmem>>, vector<8x128xf32>,
    return
  }
  func.func @transform_0(%arg0: i32, %arg1: i32) -> (i32, i32) {
    %c0_i32 = arith.constant 0 : i32
    %c0_i32_0 = arith.constant 0 : i32
    return %c0_i32, %arg1 : i32, i32
  }
  func.func @transform_1(%arg0: i32, %arg1: i32) -> (i32, i32) {
    %c0_i32 = arith.constant 0 : i32
    %c0_i32_0 = arith.constant 0 : i32
    return %arg0, %c0_i32 : i32, i32
  }
  func.func @transform_2(%arg0: i32, %arg1: i32) -> (i32, i32) {
    %c0_i32 = arith.constant 0 : i32
    return %arg0, %arg1 : i32, i32
  }
}

module attributes {stable_mosaic.version = 11 : i64} {
  func.func @_rotate_onehot_kernel(%arg0: i32, %arg1: i32, %arg2: memref<1x128xi32, #tpu.memory_space<vmem>>, %arg3: memref<8x256xf32, #tpu.memory_space<vmem>>, %arg4: memref<8x128xf32, #tpu.memory_space<vmem>>) attributes {dimension_semantics = [#tpu.dimension_semantics<parallel>, #tpu.dimension_semantics<arbitrary>], iteration_bounds = array<i64: 2, 1>, scalar_prefetch = 0 : i64, scratch_operands = 0 : i64, tpu.core_type = #tpu.core_type<tc>, window_params = [{transform_indices = @transform_0, window_bounds = array<i64: 1, 128>}, {transform_indices = @transform_1, window_bounds = array<i64: 8, 256>}, {transform_indices = @transform_2, window_bounds = array<i64: 8, 128>}]} {
    %c256_i32 = arith.constant 256 : i32
    %0 = arith.muli %arg1, %c256_i32 : i32
    %c0 = arith.constant 0 : index
    %c0_0 = arith.constant 0 : index
    %1 = vector.load %arg2[%c0, %c0_0] : memref<1x128xi32, #tpu.memory_space<vmem>>, vector<1x128xi32>
    %2 = vector.broadcast %0 : i32 to vector<1x128xi32>
    %3 = arith.subi %1, %2 : vector<1x128xi32>
    %4 = tpu.iota {dimensions = array<i32: 0>} : vector<256x128xi32>
    %5 = vector.broadcast %3 : vector<1x128xi32> to vector<256x128xi32>
    %6 = arith.cmpi eq, %4, %5 : vector<256x128xi32>
    %7 = arith.extui %6 : vector<256x128xi1> to vector<256x128xi32>
    %8 = arith.sitofp %7 : vector<256x128xi32> to vector<256x128xf32>
    %c0_1 = arith.constant 0 : index
    %c0_2 = arith.constant 0 : index
    %9 = vector.load %arg3[%c0_1, %c0_2] : memref<8x256xf32, #tpu.memory_space<vmem>>, vector<8x256xf32>
    %cst = arith.constant dense<0.000000e+00> : vector<8x128xf32>
    %10 = tpu.matmul %9, %8, %cst {dimension_numbers = #tpu.dot_dimension_numbers<[1], [0], [0], [1], [0, 0, 1, 1], [], []>} : vector<8x256xf32>, vector<256x128xf32>, vector<8x128xf32> -> vector<8x128xf32>
    %c0_i32 = arith.constant 0 : i32
    %11 = arith.cmpi eq, %arg1, %c0_i32 : i32
    %12 = arith.extui %11 : i1 to i32
    %c0_i32_3 = arith.constant 0 : i32
    %13 = arith.cmpi ne, %12, %c0_i32_3 : i32
    scf.if %13 {
      %c0_6 = arith.constant 0 : index
      %c0_7 = arith.constant 0 : index
      %17 = vector.load %arg4[%c0_6, %c0_7] : memref<8x128xf32, #tpu.memory_space<vmem>>, vector<8x128xf32>
      tpu.vector_store %arg4[%c0_6, %c0_7], %10 {strides = array<i32>} : memref<8x128xf32, #tpu.memory_space<vmem>>, vector<8x128xf32>,
    } else {
    }
    %c0_i32_4 = arith.constant 0 : i32
    %14 = arith.cmpi ne, %arg1, %c0_i32_4 : i32
    %15 = arith.extui %14 : i1 to i32
    %c0_i32_5 = arith.constant 0 : i32
    %16 = arith.cmpi ne, %15, %c0_i32_5 : i32
    scf.if %16 {
      %c0_6 = arith.constant 0 : index
      %c0_7 = arith.constant 0 : index
      %17 = vector.load %arg4[%c0_6, %c0_7] : memref<8x128xf32, #tpu.memory_space<vmem>>, vector<8x128xf32>
      %18 = arith.addf %17, %10 : vector<8x128xf32>
      %c0_8 = arith.constant 0 : index
      %c0_9 = arith.constant 0 : index
      %19 = vector.load %arg4[%c0_8, %c0_9] : memref<8x128xf32, #tpu.memory_space<vmem>>, vector<8x128xf32>
      tpu.vector_store %arg4[%c0_8, %c0_9], %18 {strides = array<i32>} : memref<8x128xf32, #tpu.memory_space<vmem>>, vector<8x128xf32>,
    } else {
    }
    return
  }
  func.func @transform_0(%arg0: i32, %arg1: i32) -> (i32, i32) {
    %c0_i32 = arith.constant 0 : i32
    %c0_i32_0 = arith.constant 0 : i32
    return %c0_i32, %arg0 : i32, i32
  }
  func.func @transform_1(%arg0: i32, %arg1: i32) -> (i32, i32) {
    %c0_i32 = arith.constant 0 : i32
    %c0_i32_0 = arith.constant 0 : i32
    return %c0_i32, %arg1 : i32, i32
  }
  func.func @transform_2(%arg0: i32, %arg1: i32) -> (i32, i32) {
    %c0_i32 = arith.constant 0 : i32
    %c0_i32_0 = arith.constant 0 : i32
    return %c0_i32, %arg0 : i32, i32
  }
}

</mosaic_0001>

<bundles_post_ra>
// kernel: branch_1_fun.2
= control target key start
LH: loop header
LB: loop body
LE: loop exit
PB: predicated region body
PF: predicated region fallthrough
CT: control target
= control target key end

     0   :  { %s639_s9 = smov 0   ;;  %s641_s10 = smov 0   ;;  %s782_s0 = inlined_call_operand.vmem [shape: s32[1,256], index: 0, kind: input, shape index: {}]   ;;  %s783_s1 = inlined_call_operand.vmem [shape: f32[8,256], index: 1, kind: input, shape index: {}]   ;;  %s784_s2 = inlined_call_operand.vmem [shape: f32[8,256], index: 2, kind: output, shape index: {}]  }
   0x1   :  { %s643_s11 = smov 0  }
   0x2 LB: > { %s24_s12 = sadd.s32 1, %s617_s10  ;;  %p470_p0 = scmp.ge.s32.totalorder %s621_s11, 1  ;;  %s621_s11 = sphi %s643_s11, %s12_s11   ;;  %s617_s10 = sphi %s641_s10, %s786_s10   ;;  %s613_s9 = sphi %s639_s9, %s785_s9  }
   0x3   : > { %p26_p1 = scmp.ge.s32.totalorder %s24_s12, 2  ;;  %p133_p2 = scmp.lt.s32.totalorder %s621_s11, 3 }
   0x5   : > { %s788_s12 = smov (%p26_p1, %s24_s12), 0  ;;  %p134_p3 = pnand %p470_p0, %p133_p2 }
   0x6   : > { %p157_p4 = scmp.lt.s32.totalorder (!%p134_p3), %s613_s9, 1 }
   0x7   : > { %137 = sbr.rel (%p134_p3) target bundleno = 249 (0xf9), region = 28 }
   0xc   : > { %v174_v0 = vlaneseq  ;;  %v308_v1 = vld [vmem:[%s783_s1 + $0x8] sm:$0xff]  ;;  %s790_s9 = smov (!%p157_p4, %s613_s9), 1  ;;  %v623_v11 = vmov 1.0   ;;  %v307_v36 = vld [vmem:[%s783_s1] sm:$0xff] }
   0xd   : > { %373 = vmatprep.mubr.f32.mxu0 %v308_v1  ;;  %s159_s17 = scalar_lea.vmem %s782_s0, %s790_s9  ;;  %s471_s20 = sshll.u32 %s790_s9, 3 }
   0xe   : > { %v662_v2 = vshrl.u32 %v174_v0, 7  ;;  %v672_v7 = vld [vmem:[%s159_s17] ss:$0 sm:$0xff]  ;;  %s169_s23 = scalar_lea.vmem %s784_s2, %s471_s20 }
  0x10   : > { %v206_v3 = vadd.s32 248, %v662_v2  ;;  %v190_v4 = vadd.s32 120, %v662_v2  ;;  %v205_v5 = vadd.s32 240, %v662_v2  ;;  %v189_v6 = vadd.s32 112, %v662_v2 }
  0x11   : > { %v204_v8 = vadd.s32 232, %v662_v2  ;;  %v188_v9 = vadd.s32 104, %v662_v2  ;;  %v203_v10 = vadd.s32 224, %v662_v2  ;;  %v187_v12 = vadd.s32 96, %v662_v2 }
  0x12   : > { %vm242_vm0 = vcmp.eq.s32.totalorder %v206_v3, %v672_v7  ;;  %vm226_vm1 = vcmp.eq.s32.totalorder %v190_v4, %v672_v7  ;;  %vm241_vm2 = vcmp.eq.s32.totalorder %v205_v5, %v672_v7  ;;  %vm225_vm3 = vcmp.eq.s32.totalorder %v189_v6, %v672_v7 }
  0x13   : > { %539 = vmatprep.subr.msk.mxu0 %vm242_vm0, %v623_v11  ;;  %vm240_vm4 = vcmp.eq.s32.totalorder %v204_v8, %v672_v7  ;;  %v202_v13 = vadd.s32 216, %v662_v2  ;;  %vm224_vm5 = vcmp.eq.s32.totalorder %v188_v9, %v672_v7  ;;  %v186_v14 = vadd.s32 88, %v662_v2 }
  0x14   : > { %540 = vmatpush3.msk.msra.mxu0 %vm226_vm1, %v623_v11  ;;  %vm239_vm6 = vcmp.eq.s32.totalorder %v203_v10, %v672_v7  ;;  %v201_v15 = vadd.s32 208, %v662_v2  ;;  %vm223_vm7 = vcmp.eq.s32.totalorder %v187_v12, %v672_v7  ;;  %v185_v16 = vadd.s32 80, %v662_v2 }
  0x15   : > { %541 = vmatprep.subr.msk.mxu0 %vm241_vm2, %v623_v11  ;;  %vm238_vm8 = vcmp.eq.s32.totalorder %v202_v13, %v672_v7  ;;  %v200_v17 = vadd.s32 200, %v662_v2  ;;  %vm222_vm9 = vcmp.eq.s32.totalorder %v186_v14, %v672_v7  ;;  %v184_v18 = vadd.s32 72, %v662_v2 }
  0x16   : > { %542 = vmatpush3.msk.msra.mxu0 %vm225_vm3, %v623_v11  ;;  %vm237_vm10 = vcmp.eq.s32.totalorder %v201_v15, %v672_v7  ;;  %v199_v19 = vadd.s32 192, %v662_v2  ;;  %vm221_vm11 = vcmp.eq.s32.totalorder %v185_v16, %v672_v7  ;;  %v183_v20 = vadd.s32 64, %v662_v2 }
  0x17   : > { %543 = vmatprep.subr.msk.mxu0 %vm240_vm4, %v623_v11  ;;  %vm236_vm12 = vcmp.eq.s32.totalorder %v200_v17, %v672_v7  ;;  %v198_v21 = vadd.s32 184, %v662_v2  ;;  %vm220_vm13 = vcmp.eq.s32.totalorder %v184_v18, %v672_v7  ;;  %v182_v22 = vadd.s32 56, %v662_v2 }
  0x18   : > { %544 = vmatpush3.msk.msra.mxu0 %vm224_vm5, %v623_v11  ;;  %vm235_vm14 = vcmp.eq.s32.totalorder %v199_v19, %v672_v7  ;;  %v197_v23 = vadd.s32 176, %v662_v2  ;;  %vm219_vm15 = vcmp.eq.s32.totalorder %v183_v20, %v672_v7  ;;  %v181_v24 = vadd.s32 48, %v662_v2 }
  0x19   : > { %545 = vmatprep.subr.msk.mxu0 %vm239_vm6, %v623_v11  ;;  %vm234_vm0 = vcmp.eq.s32.totalorder %v198_v21, %v672_v7  ;;  %v196_v25 = vadd.s32 168, %v662_v2  ;;  %vm218_vm1 = vcmp.eq.s32.totalorder %v182_v22, %v672_v7  ;;  %v180_v26 = vadd.s32 40, %v662_v2 }
  0x1a   : > { %546 = vmatpush3.msk.msra.mxu0 %vm223_vm7, %v623_v11  ;;  %vm233_vm2 = vcmp.eq.s32.totalorder %v197_v23, %v672_v7  ;;  %v195_v27 = vadd.s32 160, %v662_v2  ;;  %vm217_vm3 = vcmp.eq.s32.totalorder %v181_v24, %v672_v7  ;;  %v179_v28 = vadd.s32 32, %v662_v2 }
  0x1b   : > { %547 = vmatprep.subr.msk.mxu0 %vm238_vm8, %v623_v11  ;;  %vm232_vm4 = vcmp.eq.s32.totalorder %v196_v25, %v672_v7  ;;  %v194_v29 = vadd.s32 152, %v662_v2  ;;  %vm216_vm5 = vcmp.eq.s32.totalorder %v180_v26, %v672_v7  ;;  %v178_v30 = vadd.s32 24, %v662_v2 }
  0x1c   : > { %548 = vmatpush3.msk.msra.mxu0 %vm222_vm9, %v623_v11  ;;  %vm231_vm6 = vcmp.eq.s32.totalorder %v195_v27, %v672_v7  ;;  %v193_v31 = vadd.s32 144, %v662_v2  ;;  %vm215_vm7 = vcmp.eq.s32.totalorder %v179_v28, %v672_v7  ;;  %v177_v32 = vadd.s32 16, %v662_v2 }
  0x1d   : > { %549 = vmatprep.subr.msk.mxu0 %vm237_vm10, %v623_v11  ;;  %vm230_vm8 = vcmp.eq.s32.totalorder %v194_v29, %v672_v7  ;;  %v192_v33 = vadd.s32 136, %v662_v2  ;;  %vm214_vm9 = vcmp.eq.s32.totalorder %v178_v30, %v672_v7  ;;  %v176_v34 = vadd.s32 8, %v662_v2 }
  0x1e   : > { %550 = vmatpush3.msk.msra.mxu0 %vm221_vm11, %v623_v11  ;;  %vm229_vm10 = vcmp.eq.s32.totalorder %v193_v31, %v672_v7  ;;  %v191_v35 = vadd.s32 128, %v662_v2  ;;  %vm213_vm11 = vcmp.eq.s32.totalorder %v177_v32, %v672_v7 }
  0x1f   : > { %551 = vmatprep.subr.msk.mxu0 %vm236_vm12, %v623_v11  ;;  %vm228_vm12 = vcmp.eq.s32.totalorder %v192_v33, %v672_v7 }
  0x20   : > { %552 = vmatpush3.msk.msra.mxu0 %vm220_vm13, %v623_v11  ;;  %vm212_vm13 = vcmp.eq.s32.totalorder %v176_v34, %v672_v7 }
  0x21   : > { %553 = vmatprep.subr.msk.mxu0 %vm235_vm14, %v623_v11  ;;  %vm227_vm14 = vcmp.eq.s32.totalorder %v191_v35, %v672_v7 }
  0x22   : > { %554 = vmatpush3.msk.msra.mxu0 %vm219_vm15, %v623_v11  ;;  %vm211_vm15 = vcmp.eq.s32.totalorder %v662_v2, %v672_v7 }
  0x23   : > { %555 = vmatprep.subr.msk.mxu0 %vm234_vm0, %v623_v11 }
  0x24   : > { %556 = vmatpush3.msk.msra.mxu0 %vm218_vm1, %v623_v11 }
  0x25   : > { %557 = vmatprep.subr.msk.mxu0 %vm233_vm2, %v623_v11 }
  0x26   : > { %558 = vmatpush3.msk.msra.mxu0 %vm217_vm3, %v623_v11 }
  0x27   : > { %559 = vmatprep.subr.msk.mxu0 %vm232_vm4, %v623_v11 }
  0x28   : > { %560 = vmatpush3.msk.msra.mxu0 %vm216_vm5, %v623_v11 }
  0x29   : > { %561 = vmatprep.subr.msk.mxu0 %vm231_vm6, %v623_v11 }
  0x2a   : > { %562 = vmatpush3.msk.msra.mxu0 %vm215_vm7, %v623_v11 }
  0x2b   : > { %563 = vmatprep.subr.msk.mxu0 %vm230_vm8, %v623_v11 }
  0x2c   : > { %564 = vmatpush3.msk.msra.mxu0 %vm214_vm9, %v623_v11 }
  0x2d   : > { %565 = vmatprep.subr.msk.mxu0 %vm229_vm10, %v623_v11 }
  0x2e   : > { %566 = vmatpush3.msk.msra.mxu0 %vm213_vm11, %v623_v11 }
  0x2f   : > { %567 = vmatprep.subr.msk.mxu0 %vm228_vm12, %v623_v11 }
  0x30   : > { %568 = vmatpush3.msk.msra.mxu0 %vm212_vm13, %v623_v11 }
  0x31   : > { %569 = vmatprep.subr.msk.mxu0 %vm227_vm14, %v623_v11 }
  0x32   : > { %570 = vmatpush3.msk.msra.mxu0 %vm211_vm15, %v623_v11 }
  0x33   : > { %374 = vmatmul.mubr.f32.vlgmr.msra.gmra.mxu0 %v307_v36 }
  0xf3   : > { %v571_v37 = vpop.f32.mrf.mxu0 }
  0xf5   : > { %v572_v38 = vpop.f32.mrf.mxu0 }
  0xf6   : > { %v573_v39 = vadd.f32 %v572_v38, %v571_v37 }
  0xf8   : > { %383 = vst [vmem:[%s169_s23] sm:$0xff] %v573_v39 }
  0xf9 PF: > { %s12_s11 = sadd.s32 1, %s621_s11   ;;  %s785_s9 = smov %s617_s10 }
  0xfa   : > { %p9_p5 = scmp.ge.s32.totalorder %s12_s11, 4   ;;  %s786_s10 = smov %s788_s12 }
  0xfc   :  { %11 = sbr.rel (!%p9_p5) target bundleno = 2 (0x2), region = 69 }

</bundles_post_ra>
